<compile_context>
chip_gen: v7x
topology: tpu7x:2x2x1
jax: 0.10.0
libtpu: 0.0.40
codegen_flags: <defaults>
</compile_context>

<pallas_src>
import functools

import jax
import jax.numpy as jnp
from jax.experimental import pallas as pl
from jax.experimental.pallas import tpu as pltpu


# ----------------------------- kernel body ---------------------------------

def _value_net_kernel(x_ref, w12_ref, b12_ref, w3_ref, b3_ref, o_ref, *, slope):
    """Fused forward: x @ W12 + b12 -> leaky_relu -> <., w3> + b3 -> leaky_relu."""
    # Single MXU matmul (the two activation-free Linears were pre-fused).
    h = jnp.dot(x_ref[...], w12_ref[...], preferred_element_type=jnp.float32)
    h = h + b12_ref[...]                             # b12 is f32 [1, D]
    h = jnp.where(h > 0, h, slope * h)               # leaky_relu in f32 (VPU)

    # Width-1 output projection: VPU multiply + lane reduction (no MXU push
    # for a 1-wide output).
    w3_row = w3_ref[...].astype(jnp.float32)         # [1, D]
    y = jnp.sum(h * w3_row, axis=-1, keepdims=True)  # [tb, 1]
    y = y + b3_ref[...].astype(jnp.float32)
    y = jnp.where(y > 0, y, slope * y)               # final leaky_relu

    # Lane-dense store: [tb, 1] -> [1, 1, tb] (XLU transpose; XLU is idle here).
    tb = o_ref.shape[-1]
    o_ref[...] = jnp.transpose(y).reshape(1, 1, tb).astype(o_ref.dtype)


# ----------------------------- tile sizing ----------------------------------

def _round_up(x, m):
    return ((x + m - 1) // m) * m


def _vmem_capacity_bytes():
    cap = 64 << 20                      # conservative default (v7x per-TC VMEM)
    try:
        cap = int(getattr(pltpu.get_tpu_info(), "vmem_capacity_bytes", cap) or cap)
    except Exception:
        pass
    return cap


def _choose_batch_tile(B, dim_input, dim_output, x_itemsize, w_itemsize, x_buffers):
    """Pick the batch tile from a VMEM budget + HBM step-overhead amortization."""
    vmem_cap = _vmem_capacity_bytes()
    budget = int(vmem_cap * 0.55)       # headroom for compiler-internal scratch

    # Resident weights/biases.  Conservatively budget 2 weight buffers even
    # though we request single-buffering (Buffered(1)) below.
    fixed = (2 * dim_input * dim_output * w_itemsize
             + 4 * dim_output * 4 + 4096)
    # Per-batch-row VMEM: streamed x (x_buffers deep), f32 h intermediate,
    # double-buffered output row.
    per_row = x_buffers * dim_input * x_itemsize + dim_output * 4 + 2 * 4
    tb_vmem = max((budget - fixed) // per_row, 128)

    # Amortize the ~0.35 us per-grid-step overhead: target ~4 MiB of x per step.
    tb_hbm = _round_up(max((4 << 20) // max(dim_input * x_itemsize, 1), 1024), 128)

    tb = int(min(tb_vmem, tb_hbm))
    if B > 256:
        # Guarantee >=2 grid steps so the "parallel" batch axis can shard
        # across both v7x TensorCores.
        tb = min(tb, _round_up(pl.cdiv(B, 2), 128))
    if tb >= B:
        return B                        # single full-batch tile (small B)
    return max((tb // 128) * 128, 8)    # sublane/lane aligned tile


# ----------------------------- host-side param fusion -----------------------

def fuse_mlp_params(w1, b1, w2, b2):
    """Fuse the two activation-free Linears.  Call ONCE (weights are static),
    outside the per-batch forward, so the extra D x D matmul is not paid per call."""
    w12 = (w1.astype(jnp.float32) @ w2.astype(jnp.float32)).astype(w1.dtype)
    b12 = (b1.astype(jnp.float32) @ w2.astype(jnp.float32)
           + b2.astype(jnp.float32))                     # [1, dim_output], f32
    return w12, b12


# ----------------------------- wrapper ---------------------------------------

def value_net_forward(x, w12, b12, w3, b3, *, slope, out_dtype=None,
                      stream_dtype=None, x_buffers=2, single_buffer_weights=True):
    """x: [B, dim_input]; w12: [dim_input, dim_output] (pre-fused w1@w2);
    b12: [1, dim_output]; w3: [dim_output, 1]; b3: [1, 1].  Returns [B, 1]."""
    B, dim_input = x.shape
    dim_output = w12.shape[1]
    out_dtype = out_dtype or x.dtype

    if stream_dtype is not None:
        # x is the only large streamed operand: halving its bytes ~2x throughput
        # on an HBM-bound kernel; accumulation stays f32 in the kernel.
        x = x.astype(stream_dtype)
        w12 = w12.astype(stream_dtype)

    b12 = b12.astype(jnp.float32).reshape(1, dim_output)
    w3_row = w3.reshape(1, dim_output)                   # [1, dim_output]
    b3 = b3.reshape(1, 1)

    x_itemsize = jnp.dtype(x.dtype).itemsize
    w_itemsize = jnp.dtype(w12.dtype).itemsize
    tb = _choose_batch_tile(B, dim_input, dim_output, x_itemsize, w_itemsize,
                            x_buffers)
    num_tiles = pl.cdiv(B, tb)

    # Explicit VMEM limit sized to the actual footprint (v7x 64 MiB physical,
    # v5e 16 MiB scoped default would otherwise reject/limit larger tiles).
    needed = (x_buffers * tb * dim_input * x_itemsize          # streamed x
              + tb * dim_output * 4                            # f32 h intermediate
              + 2 * dim_input * dim_output * w_itemsize        # resident W12
              + 4 * dim_output * 4                             # small biases/w3
              + 2 * tb * 4)                                    # output rows
    vmem_cap = _vmem_capacity_bytes()
    vmem_limit = int(min(vmem_cap - (2 << 20),
                         max(needed + (4 << 20), 32 << 20)))

    kernel = functools.partial(_value_net_kernel, slope=float(slope))

    def build(weight_pipeline_mode):
        def const(arr):
            kw = {}
            if weight_pipeline_mode is not None:
                kw["pipeline_mode"] = weight_pipeline_mode
            return pl.BlockSpec(arr.shape, lambda i: (0,) * arr.ndim, **kw)

        x_kw = {}
        if x_buffers != 2:                                   # 2 is the default depth
            x_kw["pipeline_mode"] = pl.Buffered(x_buffers)

        return pl.pallas_call(
            kernel,
            out_shape=jax.ShapeDtypeStruct((num_tiles, 1, tb), out_dtype),
            grid=(num_tiles,),
            in_specs=[
                pl.BlockSpec((tb, dim_input), lambda i: (i, 0), **x_kw),  # streamed x
                const(w12),                                   # resident fused weight
                const(b12),                                   # resident fused bias
                const(w3_row),                                # resident output weight
                const(b3),                                    # resident output bias
            ],
            out_specs=pl.BlockSpec((1, 1, tb), lambda i: (i, 0, 0)),  # lane-dense row
            compiler_params=pltpu.CompilerParams(
                dimension_semantics=("parallel",),            # megacore on v7x
                vmem_limit_bytes=vmem_limit),
        )

    args = (x, w12, b12, w3_row, b3)
    if single_buffer_weights:
        try:
            out = build(pl.Buffered(1))(*args)
        except Exception:
            # pipeline_mode=Buffered(1) not supported on this jax/Mosaic build;
            # fall back to default double-buffered resident weights.
            out = build(None)(*args)
    else:
        out = build(None)(*args)

    # (num_tiles, 1, tb) lane-dense slab -> (B, 1); padded rows of the last
    # tile are discarded here (rows are independent, so garbage is harmless).
    return out.reshape(num_tiles * tb)[:B].reshape(B, 1)


# ----------------------------- params / reference ---------------------------

def make_params(key, dim_input, dim_output, dtype=jnp.float32):
    """Deterministic PyTorch-Linear-style init (uniform +/- 1/sqrt(fan_in))."""
    ks = jax.random.split(key, 6)

    def linear(kw, kb, fan_in, fan_out):
        bound = 1.0 / jnp.sqrt(fan_in)
        # stored as [in, out] so forward does x @ W (matches PyTorch x @ W.T)
        w = jax.random.uniform(kw, (fan_in, fan_out), dtype, -bound, bound)
        b = jax.random.uniform(kb, (1, fan_out), dtype, -bound, bound)
        return w, b

    w1, b1 = linear(ks[0], ks[1], dim_input, dim_output)
    w2, b2 = linear(ks[2], ks[3], dim_output, dim_output)
    w3, b3 = linear(ks[4], ks[5], dim_output, 1)
    return w1, b1, w2, b2, w3, b3


def reference_forward(x, w1, b1, w2, b2, w3, b3, slope):
    """Unfused reference matching the PyTorch module exactly."""
    lrelu = lambda v: jnp.where(v > 0, v, slope * v)
    h = x @ w1 + b1
    h = h @ w2 + b2
    h = lrelu(h)
    y = h @ w3 + b3
    return lrelu(y)


# ----------------------------- main ------------------------------------------

if __name__ == "__main__":
    dim_input = 32
    dim_output = 32
    slope = 0.01
    dtype = jnp.float32

    key = jax.random.PRNGKey(0)
    k_x1, k_x2, k_p = jax.random.split(key, 3)
    w1, b1, w2, b2, w3, b3 = make_params(k_p, dim_input, dim_output, dtype)
    # Pre-fuse the two activation-free Linears ONCE (weights are static).
    w12, b12 = fuse_mlp_params(w1, b1, w2, b2)

    # Small batch: single full-batch tile, grid=(1,).
    x_small = jax.random.normal(k_x1, (8, dim_input), dtype)
    out_small = jax.block_until_ready(
        value_net_forward(x_small, w12, b12, w3, b3, slope=slope))
    ref_small = reference_forward(x_small, w1, b1, w2, b2, w3, b3, slope)
    assert out_small.shape == (8, 1), out_small.shape
    assert jnp.allclose(out_small, ref_small, atol=1e-4, rtol=1e-4), \
        "small-batch mismatch vs reference"

    # Larger batch: exercises the multi-grid-step (megacore-sharded) path with
    # a ragged last tile and the lane-dense output reshape.
    x_big = jax.random.normal(k_x2, (300, dim_input), dtype)
    out_big = jax.block_until_ready(
        value_net_forward(x_big, w12, b12, w3, b3, slope=slope))
    ref_big = reference_forward(x_big, w1, b1, w2, b2, w3, b3, slope)
    assert out_big.shape == (300, 1), out_big.shape
    assert jnp.allclose(out_big, ref_big, atol=1e-4, rtol=1e-4), \
        "tiled-batch mismatch vs reference"

    print("KERNEL_OK")
</pallas_src>

<mosaic_0001>
module attributes {stable_mosaic.version = 11 : i64} {
  func.func @_value_net_kernel(%arg0: i32, %arg1: memref<8x32xf32, #tpu.memory_space<vmem>>, %arg2: memref<32x32xf32, #tpu.memory_space<vmem>>, %arg3: memref<1x32xf32, #tpu.memory_space<vmem>>, %arg4: memref<1x32xf32, #tpu.memory_space<vmem>>, %arg5: memref<1x1xf32, #tpu.memory_space<vmem>>, %arg6: memref<1x1x8xf32, #tpu.memory_space<vmem>>) attributes {dimension_semantics = [#tpu.dimension_semantics<parallel>], iteration_bounds = array<i64: 1>, scalar_prefetch = 0 : i64, scratch_operands = 0 : i64, tpu.core_type = #tpu.core_type<tc>, window_params = [{transform_indices = @transform_0, window_bounds = array<i64: 8, 32>}, {pipeline_mode = #tpu.pipeline_mode<synchronous>, transform_indices = @transform_1, window_bounds = array<i64: 32, 32>}, {pipeline_mode = #tpu.pipeline_mode<synchronous>, transform_indices = @transform_2, window_bounds = array<i64: 1, 32>}, {pipeline_mode = #tpu.pipeline_mode<synchronous>, transform_indices = @transform_3, window_bounds = array<i64: 1, 32>}, {pipeline_mode = #tpu.pipeline_mode<synchronous>, transform_indices = @transform_4, window_bounds = array<i64: 1, 1>}, {transform_indices = @transform_5, window_bounds = array<i64: 1, 1, 8>}]} {
    %c0 = arith.constant 0 : index
    %c0_0 = arith.constant 0 : index
    %0 = vector.load %arg1[%c0, %c0_0] : memref<8x32xf32, #tpu.memory_space<vmem>>, vector<8x32xf32>
    %c0_1 = arith.constant 0 : index
    %c0_2 = arith.constant 0 : index
    %1 = vector.load %arg2[%c0_1, %c0_2] : memref<32x32xf32, #tpu.memory_space<vmem>>, vector<32x32xf32>
    %cst = arith.constant dense<0.000000e+00> : vector<8x32xf32>
    %2 = tpu.matmul %0, %1, %cst {dimension_numbers = #tpu.dot_dimension_numbers<[1], [0], [0], [1], [0, 0, 1, 1], [], []>} : vector<8x32xf32>, vector<32x32xf32>, vector<8x32xf32> -> vector<8x32xf32>
    %c0_3 = arith.constant 0 : index
    %c0_4 = arith.constant 0 : index
    %3 = vector.load %arg3[%c0_3, %c0_4] : memref<1x32xf32, #tpu.memory_space<vmem>>, vector<1x32xf32>
    %4 = vector.broadcast %3 : vector<1x32xf32> to vector<8x32xf32>
    %5 = arith.addf %2, %4 : vector<8x32xf32>
    %cst_5 = arith.constant 0.000000e+00 : f32
    %6 = vector.broadcast %cst_5 : f32 to vector<8x32xf32>
    %7 = arith.cmpf ogt, %5, %6 : vector<8x32xf32>
    %cst_6 = arith.constant 0.00999999977 : f32
    %8 = vector.broadcast %cst_6 : f32 to vector<8x32xf32>
    %9 = arith.mulf %8, %5 : vector<8x32xf32>
    %10 = arith.select %7, %5, %9 : vector<8x32xi1>, vector<8x32xf32>
    %c0_7 = arith.constant 0 : index
    %c0_8 = arith.constant 0 : index
    %11 = vector.load %arg4[%c0_7, %c0_8] : memref<1x32xf32, #tpu.memory_space<vmem>>, vector<1x32xf32>
    %12 = vector.broadcast %11 : vector<1x32xf32> to vector<8x32xf32>
    %13 = arith.mulf %10, %12 : vector<8x32xf32>
    %cst_9 = arith.constant dense<0.000000e+00> : vector<8xf32>
    %14 = vector.multi_reduction <add>, %13, %cst_9 [1] : vector<8x32xf32> to vector<8xf32>
    %15 = vector.shape_cast %14 : vector<8xf32> to vector<8x1xf32>
    %c0_10 = arith.constant 0 : index
    %c0_11 = arith.constant 0 : index
    %16 = vector.load %arg5[%c0_10, %c0_11] : memref<1x1xf32, #tpu.memory_space<vmem>>, vector<1x1xf32>
    %17 = vector.broadcast %16 : vector<1x1xf32> to vector<8x1xf32>
    %18 = arith.addf %15, %17 : vector<8x1xf32>
    %cst_12 = arith.constant 0.000000e+00 : f32
    %19 = vector.broadcast %cst_12 : f32 to vector<8x1xf32>
    %20 = arith.cmpf ogt, %18, %19 : vector<8x1xf32>
    %cst_13 = arith.constant 0.00999999977 : f32
    %21 = vector.broadcast %cst_13 : f32 to vector<8x1xf32>
    %22 = arith.mulf %21, %18 : vector<8x1xf32>
    %23 = arith.select %20, %18, %22 : vector<8x1xi1>, vector<8x1xf32>
    %24 = tpu.transpose %23, [1, 0] : vector<8x1xf32> -> vector<1x8xf32>
    %25 = vector.shape_cast %24 : vector<1x8xf32> to vector<1x1x8xf32>
    %c0_14 = arith.constant 0 : index
    %c0_15 = arith.constant 0 : index
    %c0_16 = arith.constant 0 : index
    %26 = vector.load %arg6[%c0_14, %c0_15, %c0_16] : memref<1x1x8xf32, #tpu.memory_space<vmem>>, vector<1x1x8xf32>
    tpu.vector_store %arg6[%c0_14, %c0_15, %c0_16], %25 {strides = array<i32>} : memref<1x1x8xf32, #tpu.memory_space<vmem>>, vector<1x1x8xf32>,
    return
  }
  func.func @transform_0(%arg0: i32) -> (i32, i32) {
    %c0_i32 = arith.constant 0 : i32
    %c0_i32_0 = arith.constant 0 : i32
    return %arg0, %c0_i32 : i32, i32
  }
  func.func @transform_1(%arg0: i32) -> (i32, i32) {
    %c0_i32 = arith.constant 0 : i32
    %c0_i32_0 = arith.constant 0 : i32
    %c0_i32_1 = arith.constant 0 : i32
    return %c0_i32, %c0_i32_0 : i32, i32
  }
  func.func @transform_2(%arg0: i32) -> (i32, i32) {
    %c0_i32 = arith.constant 0 : i32
    %c0_i32_0 = arith.constant 0 : i32
    %c0_i32_1 = arith.constant 0 : i32
    return %c0_i32, %c0_i32_0 : i32, i32
  }
  func.func @transform_3(%arg0: i32) -> (i32, i32) {
    %c0_i32 = arith.constant 0 : i32
    %c0_i32_0 = arith.constant 0 : i32
    %c0_i32_1 = arith.constant 0 : i32
    return %c0_i32, %c0_i32_0 : i32, i32
  }
  func.func @transform_4(%arg0: i32) -> (i32, i32) {
    %c0_i32 = arith.constant 0 : i32
    %c0_i32_0 = arith.constant 0 : i32
    %c0_i32_1 = arith.constant 0 : i32
    return %c0_i32, %c0_i32_0 : i32, i32
  }
  func.func @transform_5(%arg0: i32) -> (i32, i32, i32) {
    %c0_i32 = arith.constant 0 : i32
    %c0_i32_0 = arith.constant 0 : i32
    %c0_i32_1 = arith.constant 0 : i32
    return %arg0, %c0_i32, %c0_i32_0 : i32, i32, i32
  }
}

module attributes {stable_mosaic.version = 11 : i64} {
  func.func @_value_net_kernel(%arg0: i32, %arg1: memref<8x32xf32, #tpu.memory_space<vmem>>, %arg2: memref<32x32xf32, #tpu.memory_space<vmem>>, %arg3: memref<1x32xf32, #tpu.memory_space<vmem>>, %arg4: memref<1x32xf32, #tpu.memory_space<vmem>>, %arg5: memref<1x1xf32, #tpu.memory_space<vmem>>, %arg6: memref<1x1x8xf32, #tpu.memory_space<vmem>>) attributes {dimension_semantics = [#tpu.dimension_semantics<parallel>], iteration_bounds = array<i64: 1>, scalar_prefetch = 0 : i64, scratch_operands = 0 : i64, tpu.core_type = #tpu.core_type<tc>, window_params = [{transform_indices = @transform_0, window_bounds = array<i64: 8, 32>}, {pipeline_mode = #tpu.pipeline_mode<synchronous>, transform_indices = @transform_1, window_bounds = array<i64: 32, 32>}, {pipeline_mode = #tpu.pipeline_mode<synchronous>, transform_indices = @transform_2, window_bounds = array<i64: 1, 32>}, {pipeline_mode = #tpu.pipeline_mode<synchronous>, transform_indices = @transform_3, window_bounds = array<i64: 1, 32>}, {pipeline_mode = #tpu.pipeline_mode<synchronous>, transform_indices = @transform_4, window_bounds = array<i64: 1, 1>}, {transform_indices = @transform_5, window_bounds = array<i64: 1, 1, 8>}]} {
    %c0 = arith.constant 0 : index
    %c0_0 = arith.constant 0 : index
    %0 = vector.load %arg1[%c0, %c0_0] : memref<8x32xf32, #tpu.memory_space<vmem>>, vector<8x32xf32>
    %c0_1 = arith.constant 0 : index
    %c0_2 = arith.constant 0 : index
    %1 = vector.load %arg2[%c0_1, %c0_2] : memref<32x32xf32, #tpu.memory_space<vmem>>, vector<32x32xf32>
    %cst = arith.constant dense<0.000000e+00> : vector<8x32xf32>
    %2 = tpu.matmul %0, %1, %cst {dimension_numbers = #tpu.dot_dimension_numbers<[1], [0], [0], [1], [0, 0, 1, 1], [], []>} : vector<8x32xf32>, vector<32x32xf32>, vector<8x32xf32> -> vector<8x32xf32>
    %c0_3 = arith.constant 0 : index
    %c0_4 = arith.constant 0 : index
    %3 = vector.load %arg3[%c0_3, %c0_4] : memref<1x32xf32, #tpu.memory_space<vmem>>, vector<1x32xf32>
    %4 = vector.broadcast %3 : vector<1x32xf32> to vector<8x32xf32>
    %5 = arith.addf %2, %4 : vector<8x32xf32>
    %cst_5 = arith.constant 0.000000e+00 : f32
    %6 = vector.broadcast %cst_5 : f32 to vector<8x32xf32>
    %7 = arith.cmpf ogt, %5, %6 : vector<8x32xf32>
    %cst_6 = arith.constant 0.00999999977 : f32
    %8 = vector.broadcast %cst_6 : f32 to vector<8x32xf32>
    %9 = arith.mulf %8, %5 : vector<8x32xf32>
    %10 = arith.select %7, %5, %9 : vector<8x32xi1>, vector<8x32xf32>
    %c0_7 = arith.constant 0 : index
    %c0_8 = arith.constant 0 : index
    %11 = vector.load %arg4[%c0_7, %c0_8] : memref<1x32xf32, #tpu.memory_space<vmem>>, vector<1x32xf32>
    %12 = vector.broadcast %11 : vector<1x32xf32> to vector<8x32xf32>
    %13 = arith.mulf %10, %12 : vector<8x32xf32>
    %cst_9 = arith.constant dense<0.000000e+00> : vector<8xf32>
    %14 = vector.multi_reduction <add>, %13, %cst_9 [1] : vector<8x32xf32> to vector<8xf32>
    %15 = vector.shape_cast %14 : vector<8xf32> to vector<8x1xf32>
    %c0_10 = arith.constant 0 : index
    %c0_11 = arith.constant 0 : index
    %16 = vector.load %arg5[%c0_10, %c0_11] : memref<1x1xf32, #tpu.memory_space<vmem>>, vector<1x1xf32>
    %17 = vector.broadcast %16 : vector<1x1xf32> to vector<8x1xf32>
    %18 = arith.addf %15, %17 : vector<8x1xf32>
    %cst_12 = arith.constant 0.000000e+00 : f32
    %19 = vector.broadcast %cst_12 : f32 to vector<8x1xf32>
    %20 = arith.cmpf ogt, %18, %19 : vector<8x1xf32>
    %cst_13 = arith.constant 0.00999999977 : f32
    %21 = vector.broadcast %cst_13 : f32 to vector<8x1xf32>
    %22 = arith.mulf %21, %18 : vector<8x1xf32>
    %23 = arith.select %20, %18, %22 : vector<8x1xi1>, vector<8x1xf32>
    %24 = tpu.transpose %23, [1, 0] : vector<8x1xf32> -> vector<1x8xf32>
    %25 = vector.shape_cast %24 : vector<1x8xf32> to vector<1x1x8xf32>
    %c0_14 = arith.constant 0 : index
    %c0_15 = arith.constant 0 : index
    %c0_16 = arith.constant 0 : index
    %26 = vector.load %arg6[%c0_14, %c0_15, %c0_16] : memref<1x1x8xf32, #tpu.memory_space<vmem>>, vector<1x1x8xf32>
    tpu.vector_store %arg6[%c0_14, %c0_15, %c0_16], %25 {strides = array<i32>} : memref<1x1x8xf32, #tpu.memory_space<vmem>>, vector<1x1x8xf32>,
    return
  }
  func.func @transform_0(%arg0: i32) -> (i32, i32) {
    %c0_i32 = arith.constant 0 : i32
    %c0_i32_0 = arith.constant 0 : i32
    return %arg0, %c0_i32 : i32, i32
  }
  func.func @transform_1(%arg0: i32) -> (i32, i32) {
    %c0_i32 = arith.constant 0 : i32
    %c0_i32_0 = arith.constant 0 : i32
    %c0_i32_1 = arith.constant 0 : i32
    return %c0_i32, %c0_i32_0 : i32, i32
  }
  func.func @transform_2(%arg0: i32) -> (i32, i32) {
    %c0_i32 = arith.constant 0 : i32
    %c0_i32_0 = arith.constant 0 : i32
    %c0_i32_1 = arith.constant 0 : i32
    return %c0_i32, %c0_i32_0 : i32, i32
  }
  func.func @transform_3(%arg0: i32) -> (i32, i32) {
    %c0_i32 = arith.constant 0 : i32
    %c0_i32_0 = arith.constant 0 : i32
    %c0_i32_1 = arith.constant 0 : i32
    return %c0_i32, %c0_i32_0 : i32, i32
  }
  func.func @transform_4(%arg0: i32) -> (i32, i32) {
    %c0_i32 = arith.constant 0 : i32
    %c0_i32_0 = arith.constant 0 : i32
    %c0_i32_1 = arith.constant 0 : i32
    return %c0_i32, %c0_i32_0 : i32, i32
  }
  func.func @transform_5(%arg0: i32) -> (i32, i32, i32) {
    %c0_i32 = arith.constant 0 : i32
    %c0_i32_0 = arith.constant 0 : i32
    %c0_i32_1 = arith.constant 0 : i32
    return %arg0, %c0_i32, %c0_i32_0 : i32, i32, i32
  }
}

</mosaic_0001>

<bundles_post_ra>
// kernel: tpu_custom_call.1
= control target key start
LH: loop header
LB: loop body
LE: loop exit
PB: predicated region body
PF: predicated region fallthrough
CT: control target
= control target key end

     0   :  { %s406_s0 = inlined_call_operand.hbm [shape: f32[8,32], index: 0, kind: input, shape index: {}]   ;;  %s407_s1 = inlined_call_operand.hbm [shape: f32[32,32], index: 1, kind: input, shape index: {}]   ;;  %s408_s2 = inlined_call_operand.vmem [shape: f32[1,32], index: 2, kind: input, shape index: {}]   ;;  %s409_s3 = inlined_call_operand.vmem [shape: f32[1,32], index: 3, kind: input, shape index: {}]   ;;  %s410_s4 = inlined_call_operand.<no memory space> [shape: f32[1,1], index: 4, kind: input, shape index: {}]   ;;  %s411_s5 = inlined_call_operand.hbm [shape: f32[1,1,8], index: 5, kind: output, shape index: {}]  }
   0x1   :  { %v10_v0 = vstv %s410_s4 }
   0x2   :  { %11 = vst [vmem:[#allocation2] sm:$0x1] %v10_v0 }
   0x3   :  { %12 = vsyncpa [#allocation4], 0 }
   0x4   :  { %13 = vsyncpa [#allocation7], 0 }
   0x5   :  { %14 = vsyncpa [#allocation5], 0  ;;  %s316_s20 = smov [#allocation3]   ;;  %s317_s22 = smov [#allocation6]  }
   0x6   :  { %s21_s21 = sshll.u32 %s316_s20, 4  ;;  %s30_s23 = sshll.u32 %s317_s22, 4  ;;  %s22_s21 = int_to_ptr.vmem [resolvable:$true] %s21_s21  ;;  %s357_s23 = int_to_ptr.vmem [resolvable:$true] %s30_s23 }
   0x7   :  { %s244_s26 = scalar_lea.hbm %s406_s0, 128 }
   0x8   :  { %p245_p0 = scmp.ne.s32.totalorder %s406_s0, %s244_s26  ;;  %p248_p1 = scmp.lt.u32.totalorder %s244_s26, %s406_s0 }
   0xa   :  { %p250_p2 = pnand %p248_p1, %p245_p0 }
   0xc   :  { %253 = shalt.err (!%p250_p2)
}
   0xd   :  { %s254_s30 = scalar_lea.vmem %s22_s21, 128  ;;  %p259_p4 = scmp.lt.s32.totalorder %s22_s21, %s22_s21 }
   0xe   :  { %p255_p3 = scmp.ne.s32.totalorder %s22_s21, %s254_s30  ;;  %p260_p5 = scmp.lt.s32.totalorder %s254_s30, %s254_s30 }
  0x10   :  { %p261_p6 = por %p260_p5, %p259_p4 }
  0x12   :  { %p262_p7 = pnand %p261_p6, %p255_p3 }
  0x14   :  { %265 = shalt.err (!%p262_p7)
}
  0x15   :  { %24 = dma.hbm_to_vmem [thread:$0]  %s406_s0, 128, %s22_s21, [#allocation4]  }
  0x16   :  { %s266_s10 = scalar_lea.hbm %s407_s1, 512 }
  0x17   :  { %p267_p8 = scmp.ne.s32.totalorder %s407_s1, %s266_s10  ;;  %p270_p9 = scmp.lt.u32.totalorder %s266_s10, %s407_s1 }
  0x19   :  { %p272_p10 = pnand %p270_p9, %p267_p8 }
  0x1b   :  { %275 = shalt.err (!%p272_p10)
}
  0x1c   :  { %s276_s15 = scalar_lea.vmem %s357_s23, 512  ;;  %p281_p12 = scmp.lt.s32.totalorder %s357_s23, %s357_s23 }
  0x1d   :  { %p277_p11 = scmp.ne.s32.totalorder %s357_s23, %s276_s15  ;;  %p282_p13 = scmp.lt.s32.totalorder %s276_s15, %s276_s15 }
  0x1f   :  { %p283_p0 = por %p282_p13, %p281_p12 }
  0x21   :  { %p284_p1 = pnand %p283_p0, %p277_p11 }
  0x23   :  { %287 = shalt.err (!%p284_p1)
}
  0x24   :  { %s318_s0 = smov 128   ;;  %s319_s16 = smov 8  }
  0x25   :  { %36 = dma.hbm_to_vmem [thread:$0]  %s407_s1, 512, %s357_s23, [#allocation7], %s318_s0, %s318_s0, %s319_s16  }
  0x26   :  { %310 = dma.done.wait [#allocation4], 128  }
  0x27   :  { %311 = vsyncadd [#allocation4], 4294967168 }
  0x28   :  { %312 = dma.done.wait [#allocation7], 512  }
  0x29   :  { %313 = vsyncadd [#allocation7], 4294966784  ;;  %v320_v1 = vmov 0.0|0.0   ;;  %vm321_vm0 = vmmov 0   ;;  %v322_v2 = vmov 0.0   ;;  %v50_v3 = vld [vmem:[#allocation6] sm:$0xff] }
  0x2a   :  { %230 = vmatprep.subr.bf16.mxu0 %v320_v1  ;;  %227 = vmatprep.mubr.msk.f32.mxu0 %vm321_vm0, %v322_v2  ;;  %v51_v4 = vld [vmem:[#allocation6 + $0x8] sm:$0xff]  ;;  %v52_v5 = vld [vmem:[#allocation6 + $0x10] sm:$0xff]  ;;  %v53_v7 = vld [vmem:[#allocation6 + $0x18] sm:$0xff]  ;;  %vm61_vm1 = vcmask 261120   ;;  %vm192_vm4 = vcmask 57344  }
  0x2b   :  { %v231_v6 = vpack.c.bf16 %v51_v4, %v50_v3  ;;  %v234_v8 = vpack.c.bf16 %v53_v7, %v52_v5  ;;  %v49_v9 = vld [vmem:[#allocation3] sm:$0xff]  ;;  %v210_v10 = vld [vmem:[%s408_s2] ss:$0 sm:$0xff]  ;;  %s323_s2 = smov [#allocation8]  }
  0x2c   :  { %v212_v15 = vld [vmem:[%s409_s3] ss:$0 sm:$0xff]  ;;  %s200_s22 = sshll.u32 %s323_s2, 4  ;;  %s201_s22 = int_to_ptr.vmem [resolvable:$true] %s200_s22 }
  0x2d   :  { %232 = vmatpush3.bf16.msra.mxu0 %v231_v6  ;;  %v213_v19 = vld [vmem:[#allocation2] ss:$0 sm:$0xff]  ;;  %s288_s23 = scalar_lea.vmem %s201_s22, 16  ;;  %s292_s3 = scalar_lea.vmem %s201_s22, 32 }
  0x2e   :  { %233 = vmatprep.subr.bf16.mxu0 %v320_v1  ;;  %p289_p2 = scmp.ne.s32.totalorder %s201_s22, %s288_s23  ;;  %p293_p3 = scmp.lt.s32.totalorder %s201_s22, %s201_s22 }
  0x2f   :  { %p294_p4 = scmp.lt.s32.totalorder %s292_s3, %s288_s23 }
  0x31   :  { %235 = vmatpush3.bf16.msra.mxu0 %v234_v8  ;;  %p295_p5 = por %p294_p4, %p293_p3 }
  0x33   :  { %p296_p6 = pnand %p295_p5, %p289_p2 }
  0x34   :  { %228 = vmatmul.mubr.msk.f32.vlgmr.msra.gmra.mrb[0].mxu0 %vm61_vm1, %v49_v9 }
 0x107   :  { %v131_v11 = vpop.f32.mrb[0].mxu0 }
 0x108   :  { %v132_v12 = vadd.f32 %v210_v10, %v131_v11  ;;  %v229_v13 = vpop.f32.mrb[1].mxu0 }
 0x10a   :  { %v136_v14 = vmul.f32 0.01, %v132_v12  ;;  %vm135_vm2 = vcmp.gt.f32.partialorder %v132_v12, 0.0 }
 0x10c   :  { %v137_v16 = vsel %vm135_vm2, %v132_v12, %v136_v14 }
 0x10d   :  { %v145_v17 = vmul.f32 %v212_v15, %v137_v16 }
 0x10f   :  { %v146_v18 = vsel %vm61_vm1, %v145_v17, 0.0 }
 0x110   :  { %147 = vadd.xlane.f32.xlu0 %v146_v18 }
 0x19d   :  { %v148_v20 = vpop.xlane.xlu0 %147 }
 0x19e   :  { %v156_v21 = vadd.f32 %v213_v19, %v148_v20 }
 0x1a0   :  { %vm157_vm3 = vcmp.gt.f32.partialorder %v156_v21, 0.0  ;;  %v158_v22 = vmul.f32 0.01, %v156_v21 }
 0x1a2   :  { %v159_v23 = vsel %vm157_vm3, %v156_v21, %v158_v22 }
 0x1a3   :  { %160 = vxpose.xlu0.b32.start.end [1/1] (short) (narrow) %v159_v23, 8 }
 0x223   :  { %v176_v24 = vpop.trf.xlu0 }
 0x224   :  { %193 = vst.msk [vmem:[#allocation8] sm:$0x1] %vm192_vm4, %v176_v24 }
 0x225   :  { %299 = shalt.err (!%p296_p6)
}
 0x226   :  { %s300_s26 = scalar_lea.hbm %s411_s5, 16 }
 0x227   :  { %p301_p7 = scmp.ne.s32.totalorder %s411_s5, %s300_s26  ;;  %p304_p8 = scmp.lt.u32.totalorder %s300_s26, %s411_s5 }
 0x229   :  { %p306_p9 = pnand %p304_p8, %p301_p7 }
 0x22b   :  { %309 = shalt.err (!%p306_p9)
}
 0x22c   :  { %203 = dma.vmem_to_hbm [thread:$0]  %s201_s22, 16, %s411_s5, [#allocation5]  }
 0x22d   :  { %314 = dma.done.wait [#allocation5], 16  }
 0x22e   :  { %315 = vsyncadd [#allocation5], 4294967280 }
 0x22f   :  { %207 = vsyncpa [#allocation4], 1 }
 0x230   :  { %208 = vsyncpa [#allocation7], 1 }
 0x231   :  { %209 = vsyncpa [#allocation5], 1 }

// kernel: tpu_custom_call.1
= control target key start
LH: loop header
LB: loop body
LE: loop exit
PB: predicated region body
PF: predicated region fallthrough
CT: control target
= control target key end

     0   :  { %s406_s0 = inlined_call_operand.hbm [shape: f32[8,32], index: 0, kind: input, shape index: {}]   ;;  %s407_s1 = inlined_call_operand.hbm [shape: f32[32,32], index: 1, kind: input, shape index: {}]   ;;  %s408_s2 = inlined_call_operand.vmem [shape: f32[1,32], index: 2, kind: input, shape index: {}]   ;;  %s409_s3 = inlined_call_operand.vmem [shape: f32[1,32], index: 3, kind: input, shape index: {}]   ;;  %s410_s4 = inlined_call_operand.<no memory space> [shape: f32[1,1], index: 4, kind: input, shape index: {}]   ;;  %s411_s5 = inlined_call_operand.hbm [shape: f32[1,1,8], index: 5, kind: output, shape index: {}]  }
   0x1   :  { %v10_v0 = vstv %s410_s4 }
   0x2   :  { %11 = vst [vmem:[#allocation2] sm:$0x1] %v10_v0 }
   0x3   :  { %12 = vsyncpa [#allocation4], 0 }
   0x4   :  { %13 = vsyncpa [#allocation7], 0 }
   0x5   :  { %14 = vsyncpa [#allocation5], 0  ;;  %s316_s20 = smov [#allocation3]   ;;  %s317_s22 = smov [#allocation6]  }
   0x6   :  { %s21_s21 = sshll.u32 %s316_s20, 4  ;;  %s30_s23 = sshll.u32 %s317_s22, 4  ;;  %s22_s21 = int_to_ptr.vmem [resolvable:$true] %s21_s21  ;;  %s357_s23 = int_to_ptr.vmem [resolvable:$true] %s30_s23 }
   0x7   :  { %s244_s26 = scalar_lea.hbm %s406_s0, 128 }
   0x8   :  { %p245_p0 = scmp.ne.s32.totalorder %s406_s0, %s244_s26  ;;  %p248_p1 = scmp.lt.u32.totalorder %s244_s26, %s406_s0 }
   0xa   :  { %p250_p2 = pnand %p248_p1, %p245_p0 }
   0xc   :  { %253 = shalt.err (!%p250_p2)
}
   0xd   :  { %s254_s30 = scalar_lea.vmem %s22_s21, 128  ;;  %p259_p4 = scmp.lt.s32.totalorder %s22_s21, %s22_s21 }
   0xe   :  { %p255_p3 = scmp.ne.s32.totalorder %s22_s21, %s254_s30  ;;  %p260_p5 = scmp.lt.s32.totalorder %s254_s30, %s254_s30 }
  0x10   :  { %p261_p6 = por %p260_p5, %p259_p4 }
  0x12   :  { %p262_p7 = pnand %p261_p6, %p255_p3 }
  0x14   :  { %265 = shalt.err (!%p262_p7)
}
  0x15   :  { %24 = dma.hbm_to_vmem [thread:$0]  %s406_s0, 128, %s22_s21, [#allocation4]  }
  0x16   :  { %s266_s10 = scalar_lea.hbm %s407_s1, 512 }
  0x17   :  { %p267_p8 = scmp.ne.s32.totalorder %s407_s1, %s266_s10  ;;  %p270_p9 = scmp.lt.u32.totalorder %s266_s10, %s407_s1 }
  0x19   :  { %p272_p10 = pnand %p270_p9, %p267_p8 }
  0x1b   :  { %275 = shalt.err (!%p272_p10)
}
  0x1c   :  { %s276_s15 = scalar_lea.vmem %s357_s23, 512  ;;  %p281_p12 = scmp.lt.s32.totalorder %s357_s23, %s357_s23 }
  0x1d   :  { %p277_p11 = scmp.ne.s32.totalorder %s357_s23, %s276_s15  ;;  %p282_p13 = scmp.lt.s32.totalorder %s276_s15, %s276_s15 }
  0x1f   :  { %p283_p0 = por %p282_p13, %p281_p12 }
  0x21   :  { %p284_p1 = pnand %p283_p0, %p277_p11 }
  0x23   :  { %287 = shalt.err (!%p284_p1)
}
  0x24   :  { %s318_s0 = smov 128   ;;  %s319_s16 = smov 8  }
  0x25   :  { %36 = dma.hbm_to_vmem [thread:$0]  %s407_s1, 512, %s357_s23, [#allocation7], %s318_s0, %s318_s0, %s319_s16  }
  0x26   :  { %310 = dma.done.wait [#allocation4], 128  }
  0x27   :  { %311 = vsyncadd [#allocation4], 4294967168 }
  0x28   :  { %312 = dma.done.wait [#allocation7], 512  }
  0x29   :  { %313 = vsyncadd [#allocation7], 4294966784  ;;  %v320_v1 = vmov 0.0|0.0   ;;  %vm321_vm0 = vmmov 0   ;;  %v322_v2 = vmov 0.0   ;;  %v50_v3 = vld [vmem:[#allocation6] sm:$0xff] }
  0x2a   :  { %230 = vmatprep.subr.bf16.mxu0 %v320_v1  ;;  %227 = vmatprep.mubr.msk.f32.mxu0 %vm321_vm0, %v322_v2  ;;  %v51_v4 = vld [vmem:[#allocation6 + $0x8] sm:$0xff]  ;;  %v52_v5 = vld [vmem:[#allocation6 + $0x10] sm:$0xff]  ;;  %v53_v7 = vld [vmem:[#allocation6 + $0x18] sm:$0xff]  ;;  %vm61_vm1 = vcmask 261120   ;;  %vm192_vm4 = vcmask 57344  }
  0x2b   :  { %v231_v6 = vpack.c.bf16 %v51_v4, %v50_v3  ;;  %v234_v8 = vpack.c.bf16 %v53_v7, %v52_v5  ;;  %v49_v9 = vld [vmem:[#allocation3] sm:$0xff]  ;;  %v210_v10 = vld [vmem:[%s408_s2] ss:$0 sm:$0xff]  ;;  %s323_s2 = smov [#allocation8]  }
  0x2c   :  { %v212_v15 = vld [vmem:[%s409_s3] ss:$0 sm:$0xff]  ;;  %s200_s22 = sshll.u32 %s323_s2, 4  ;;  %s201_s22 = int_to_ptr.vmem [resolvable:$true] %s200_s22 }
  0x2d   :  { %232 = vmatpush3.bf16.msra.mxu0 %v231_v6  ;;  %v213_v19 = vld [vmem:[#allocation2] ss:$0 sm:$0xff]  ;;  %s288_s23 = scalar_lea.vmem %s201_s22, 16  ;;  %s292_s3 = scalar_lea.vmem %s201_s22, 32 }
  0x2e   :  { %233 = vmatprep.subr.bf16.mxu0 %v320_v1  ;;  %p289_p2 = scmp.ne.s32.totalorder %s201_s22, %s288_s23  ;;  %p293_p3 = scmp.lt.s32.totalorder %s201_s22, %s201_s22 }
  0x2f   :  { %p294_p4 = scmp.lt.s32.totalorder %s292_s3, %s288_s23 }
  0x31   :  { %235 = vmatpush3.bf16.msra.mxu0 %v234_v8  ;;  %p295_p5 = por %p294_p4, %p293_p3 }
  0x33   :  { %p296_p6 = pnand %p295_p5, %p289_p2 }
  0x34   :  { %228 = vmatmul.mubr.msk.f32.vlgmr.msra.gmra.mrb[0].mxu0 %vm61_vm1, %v49_v9 }
 0x107   :  { %v131_v11 = vpop.f32.mrb[0].mxu0 }
 0x108   :  { %v132_v12 = vadd.f32 %v210_v10, %v131_v11  ;;  %v229_v13 = vpop.f32.mrb[1].mxu0 }
 0x10a   :  { %v136_v14 = vmul.f32 0.01, %v132_v12  ;;  %vm135_vm2 = vcmp.gt.f32.partialorder %v132_v12, 0.0 }
 0x10c   :  { %v137_v16 = vsel %vm135_vm2, %v132_v12, %v136_v14 }
 0x10d   :  { %v145_v17 = vmul.f32 %v212_v15, %v137_v16 }
 0x10f   :  { %v146_v18 = vsel %vm61_vm1, %v145_v17, 0.0 }
 0x110   :  { %147 = vadd.xlane.f32.xlu0 %v146_v18 }
 0x19d   :  { %v148_v20 = vpop.xlane.xlu0 %147 }
 0x19e   :  { %v156_v21 = vadd.f32 %v213_v19, %v148_v20 }
 0x1a0   :  { %vm157_vm3 = vcmp.gt.f32.partialorder %v156_v21, 0.0  ;;  %v158_v22 = vmul.f32 0.01, %v156_v21 }
 0x1a2   :  { %v159_v23 = vsel %vm157_vm3, %v156_v21, %v158_v22 }
 0x1a3   :  { %160 = vxpose.xlu0.b32.start.end [1/1] (short) (narrow) %v159_v23, 8 }
 0x223   :  { %v176_v24 = vpop.trf.xlu0 }
 0x224   :  { %193 = vst.msk [vmem:[#allocation8] sm:$0x1] %vm192_vm4, %v176_v24 }
 0x225   :  { %299 = shalt.err (!%p296_p6)
}
 0x226   :  { %s300_s26 = scalar_lea.hbm %s411_s5, 16 }
 0x227   :  { %p301_p7 = scmp.ne.s32.totalorder %s411_s5, %s300_s26  ;;  %p304_p8 = scmp.lt.u32.totalorder %s300_s26, %s411_s5 }
 0x229   :  { %p306_p9 = pnand %p304_p8, %p301_p7 }
 0x22b   :  { %309 = shalt.err (!%p306_p9)
}
 0x22c   :  { %203 = dma.vmem_to_hbm [thread:$0]  %s201_s22, 16, %s411_s5, [#allocation5]  }
 0x22d   :  { %314 = dma.done.wait [#allocation5], 16  }
 0x22e   :  { %315 = vsyncadd [#allocation5], 4294967280 }
 0x22f   :  { %207 = vsyncpa [#allocation4], 1 }
 0x230   :  { %208 = vsyncpa [#allocation7], 1 }
 0x231   :  { %209 = vsyncpa [#allocation5], 1 }

</bundles_post_ra>
